<compile_context>
chip_gen: v7x
topology: tpu7x:2x2x1
jax: 0.10.0
libtpu: 0.0.40
codegen_flags: <defaults>
</compile_context>

<pallas_src>
import functools
import math

import numpy as np

import jax
import jax.numpy as jnp
from jax import lax
from jax.experimental import pallas as pl
from jax.experimental.pallas import tpu as pltpu

EPS = 1e-6          # nn.PairwiseDistance eps (added elementwise to the difference)
GAMMA = 0.1
TAO = 10.0
B = 1.0
LAMBDA = 0.1        # PairwiseDCELoss default lambda_
THRESHOLD = 100.0

MAX_PROTOTYPES = 128   # fixed-capacity bank; 128 -> one dense lane row per mask
OUT_LANES = 128        # lane-dense per-sample output row: [loss, min_dist, count]
BIG = 1e30             # masked-min sentinel (never squared / exponentiated)


def _g_stable(z, gamma):
    # g(z) = log(1 + exp(gamma*z)) / gamma, overflow-safe softplus form.
    t = gamma * z
    return (jnp.maximum(t, 0.0) + jnp.log1p(jnp.exp(-jnp.abs(t)))) / gamma


def _pairwise_dce_scan_kernel(
        # scalar prefetch (SMEM)
        samp_labels_ref, init_count_ref,
        # inputs
        feat_ref, protos_in_ref, plabels_in_ref,
        # outputs (bank + labels are VMEM-resident across the whole grid)
        out_ref, protos_ref, plabels_ref,
        # scratch
        valid_ref,
        *, gamma, tao, b, lambda_, threshold, d_append, max_n):
    i = pl.program_id(0)
    lane = lax.broadcasted_iota(jnp.int32, (1, max_n), 1)      # (1, MAX_N)

    # --- step 0: bring the carried state into the resident refs ------------
    @pl.when(i == 0)
    def _init():
        protos_ref[...] = protos_in_ref[...]
        plabels_ref[...] = plabels_in_ref[...]
        valid_ref[...] = (lane < init_count_ref[0]).astype(jnp.float32)

    lab = samp_labels_ref[i]            # i32 scalar (SMEM)
    feat_col = feat_ref[0]              # (D, 1) f32
    y = feat_col + EPS                  # PairwiseDistance adds eps to the difference

    protos = protos_ref[...]            # (D, MAX_N) f32
    plabels = plabels_ref[...]          # (1, MAX_N) i32
    valid_f = valid_ref[...]            # (1, MAX_N) f32 (1.0 = live prototype)
    valid_b = valid_f > 0.0

    # Exact distances: ||(feat - proto) + eps||_2  (VPU square + XLU sublane reduce).
    diff = y - protos                                           # (D, MAX_N)
    d = jnp.sqrt(jnp.sum(diff * diff, axis=0, keepdims=True))   # (1, MAX_N)

    label_match = jnp.logical_and(valid_b, plabels == lab)
    label_match_f = label_match.astype(jnp.float32)

    e = jnp.where(valid_b, jnp.exp(-gamma * d), 0.0)
    d_lab = jnp.where(label_match, d, BIG)
    d_oth = jnp.where(jnp.logical_and(valid_b, jnp.logical_not(label_match)), d, BIG)
    d_all = jnp.where(valid_b, d, BIG)

    min_lab = jnp.min(d_lab, keepdims=True)        # (1, 1)
    min_oth = jnp.min(d_oth, keepdims=True)
    min_all = jnp.min(d_all, keepdims=True)
    has_label = jnp.max(label_match_f, keepdims=True) > 0.0

    # Prototypes.assign(): append when label unseen or closest same-label >= threshold.
    do_append = jnp.logical_or(jnp.logical_not(has_label), min_lab >= threshold)
    app = do_append.astype(jnp.float32)
    e_app = math.exp(-gamma * d_append)            # trace-time constant

    # DCE probability over the post-assign bank (appended proto == feature).
    one = jnp.sum(e, keepdims=True) + app * e_app
    num = jnp.sum(e * label_match_f, keepdims=True) + app * e_app
    dce = jnp.where(one > 0.0, jnp.log(one) - jnp.log(num), -jnp.log(num + 1e-6))

    # pw term 1: distance to the prototype returned by assign().
    dist_closest = jnp.where(do_append, d_append, min_lab)
    pw1 = _g_stable(b - (tao - dist_closest), gamma)

    # pw term 2: globally closest prototype (post-assign) and its label sign.
    min_lab_post = jnp.where(do_append, jnp.minimum(min_lab, d_append), min_lab)
    min_all_post = jnp.where(do_append, jnp.minimum(min_all, d_append), min_all)
    like = jnp.where(min_lab_post <= min_oth, 1.0, -1.0)
    pw2 = _g_stable(b - like * (tao - min_all_post), gamma)

    loss = dce + lambda_ * (pw1 + pw2)
    min_distance = jnp.where(has_label, min_lab, 0.0)   # pre-append, as in assign()

    # --- apply the append in place on the resident bank --------------------
    # Masked column write at column `count` (all-false mask when not appending
    # or when the fixed-capacity bank is full).
    # TODO(synk): the reference bank is an unbounded Python list; here capacity
    # overflow simply stops appending (never reached in practice).
    num_valid = jnp.sum(valid_f, keepdims=True)                       # (1,1) == count
    write_mask = jnp.logical_and(lane.astype(jnp.float32) == num_valid, do_append)
    protos_ref[...] = jnp.where(write_mask, feat_col, protos)
    plabels_ref[...] = jnp.where(write_mask, lab, plabels)
    valid_ref[...] = jnp.where(write_mask, 1.0, valid_f)
    count_after = num_valid + jnp.where(
        jnp.logical_and(do_append, num_valid < float(max_n)), 1.0, 0.0)

    # Lane-dense per-sample output row: [loss, min_distance, count_after, 0...].
    out_ref[0] = jnp.where(lane == 0, loss,
                  jnp.where(lane == 1, min_distance,
                   jnp.where(lane == 2, count_after, 0.0)))


def _build_call(num_samples, dim, *, gamma=GAMMA, tao=TAO, b=B,
                lambda_=LAMBDA, threshold=THRESHOLD):
    kernel = functools.partial(
        _pairwise_dce_scan_kernel, gamma=gamma, tao=tao, b=b, lambda_=lambda_,
        threshold=threshold, d_append=EPS * math.sqrt(dim), max_n=MAX_PROTOTYPES)
    grid_spec = pltpu.PrefetchScalarGridSpec(
        num_scalar_prefetch=2,                       # sample labels, initial count
        grid=(num_samples,),
        in_specs=[
            pl.BlockSpec((1, dim, 1), lambda i, *_: (i, 0, 0)),           # features
            pl.BlockSpec((dim, MAX_PROTOTYPES), lambda i, *_: (0, 0)),    # bank (resident)
            pl.BlockSpec((1, MAX_PROTOTYPES), lambda i, *_: (0, 0)),      # bank labels
        ],
        out_specs=[
            pl.BlockSpec((1, 1, OUT_LANES), lambda i, *_: (i, 0, 0)),     # per-sample row
            pl.BlockSpec((dim, MAX_PROTOTYPES), lambda i, *_: (0, 0)),    # new bank
            pl.BlockSpec((1, MAX_PROTOTYPES), lambda i, *_: (0, 0)),      # new bank labels
        ],
        scratch_shapes=[pltpu.VMEM((1, MAX_PROTOTYPES), jnp.float32)],    # validity mask
    )
    return pl.pallas_call(
        kernel,
        grid_spec=grid_spec,
        out_shape=(
            jax.ShapeDtypeStruct((num_samples, 1, OUT_LANES), jnp.float32),
            jax.ShapeDtypeStruct((dim, MAX_PROTOTYPES), jnp.float32),
            jax.ShapeDtypeStruct((1, MAX_PROTOTYPES), jnp.int32),
        ),
        # State is carried across grid steps -> the sample axis must be sequential.
        compiler_params=pltpu.CompilerParams(dimension_semantics=("arbitrary",)),
    )


def pairwise_dce_forward(state, features, labels):
    """Sequentially apply PairwiseDCELoss.forward to each (feature, label).

    state    = (protos_T (D, MAX_N) f32, proto_labels (1, MAX_N) i32, count () i32)
    features : (S, D) f32, labels: (S,) int
    Returns (losses (S,), min_distances (S,), new_state). Intended to be jit'ed.
    """
    protos_t, plabels, count = state
    s, dim = features.shape
    call = _build_call(s, dim)
    out, new_protos_t, new_plabels = call(
        labels.astype(jnp.int32),
        jnp.reshape(count, (1,)).astype(jnp.int32),
        features.reshape(s, dim, 1).astype(jnp.float32),
        protos_t, plabels)
    losses = out[:, 0, 0]
    min_ds = out[:, 0, 1]
    new_count = jnp.round(out[s - 1, 0, 2]).astype(jnp.int32)
    return losses, min_ds, (new_protos_t, new_plabels, new_count)


def _reference_forward(features, labels, init_protos, init_proto_labels,
                       *, gamma=GAMMA, tao=TAO, b=B, lambda_=LAMBDA,
                       threshold=THRESHOLD):
    """Pure-NumPy float64 emulation of the PyTorch PairwiseDCELoss (validation only)."""
    protos = [np.asarray(p, np.float64) for p in init_protos]
    plabels = [int(l) for l in init_proto_labels]

    def dist(x, p):
        return float(np.linalg.norm(x - p + EPS))

    def g(z):
        return math.log(1.0 + math.exp(gamma * z)) / gamma

    losses, min_ds = [], []
    for x, lab in zip(np.asarray(features, np.float64), labels):
        lab = int(lab)
        same = [j for j, l in enumerate(plabels) if l == lab]
        # Prototypes.assign
        if not same:
            min_distance = 0.0
            protos.append(x.copy()); plabels.append(lab)
            closest_feat = protos[-1]
        else:
            ds = [dist(x, protos[j]) for j in same]
            k = int(np.argmin(ds)); min_distance = ds[k]
            if min_distance < threshold:
                closest_feat = protos[same[k]]   # Prototype.update() is a no-op
            else:
                protos.append(x.copy()); plabels.append(lab)
                closest_feat = protos[-1]
        # DCELoss.probability over post-assign bank
        d_all = np.array([dist(x, p) for p in protos])
        one = np.exp(-gamma * d_all).sum()
        same_post = [j for j, l in enumerate(plabels) if l == lab]
        num = np.exp(-gamma * d_all[same_post]).sum()
        prob = num / one if one > 0.0 else num + 1e-6
        dce = -math.log(prob)
        # Pairwise terms
        pw = g(b - (tao - dist(x, closest_feat)))
        k_all = int(np.argmin(d_all))
        like = 1.0 if plabels[k_all] == lab else -1.0
        pw += g(b - like * (tao - d_all[k_all]))
        losses.append(dce + lambda_ * pw)
        min_ds.append(min_distance)
    return np.array(losses), np.array(min_ds), len(protos)


if __name__ == "__main__":
    key = jax.random.PRNGKey(0)
    k_feat, k_proto = jax.random.split(key)

    D = 32      # feature (hidden) dimension
    N0 = 8      # pre-existing prototypes
    S = 4       # samples processed sequentially inside one kernel call

    features = jax.random.normal(k_feat, (S, D), dtype=jnp.float32)
    labels = jnp.array([1, 7, 7, 2], dtype=jnp.int32)   # 7 is unseen -> one append

    init_protos = jax.random.normal(k_proto, (N0, D), dtype=jnp.float32)
    init_plabels = jnp.array([0, 0, 1, 1, 2, 2, 3, 3], dtype=jnp.int32)

    protos_t = jnp.zeros((D, MAX_PROTOTYPES), jnp.float32).at[:, :N0].set(init_protos.T)
    plabels = jnp.full((1, MAX_PROTOTYPES), -1, dtype=jnp.int32).at[0, :N0].set(init_plabels)
    state = (protos_t, plabels, jnp.int32(N0))

    step = jax.jit(pairwise_dce_forward)
    losses, min_ds, new_state = step(state, features, labels)
    losses, min_ds, new_state = jax.block_until_ready((losses, min_ds, new_state))

    # Validate against a float64 emulation of the PyTorch reference.
    ref_losses, ref_min_ds, ref_count = _reference_forward(
        np.asarray(features), np.asarray(labels),
        np.asarray(init_protos), np.asarray(init_plabels))

    assert np.all(np.isfinite(np.asarray(losses)))
    assert np.all(np.isfinite(np.asarray(min_ds)))
    np.testing.assert_allclose(np.asarray(losses), ref_losses, rtol=2e-3, atol=2e-3)
    np.testing.assert_allclose(np.asarray(min_ds), ref_min_ds, rtol=2e-3, atol=2e-3)
    assert int(new_state[2]) == ref_count == N0 + 1   # exactly one prototype appended

    print("KERNEL_OK")
</pallas_src>

<mosaic_0001>
module attributes {stable_mosaic.version = 11 : i64} {
  func.func @_pairwise_dce_scan_kernel(%arg0: i32, %arg1: memref<4xi32, #tpu.memory_space<smem>>, %arg2: memref<1xi32, #tpu.memory_space<smem>>, %arg3: memref<1x32x1xf32, #tpu.memory_space<vmem>>, %arg4: memref<32x128xf32, #tpu.memory_space<vmem>>, %arg5: memref<1x128xi32, #tpu.memory_space<vmem>>, %arg6: memref<1x1x128xf32, #tpu.memory_space<vmem>>, %arg7: memref<32x128xf32, #tpu.memory_space<vmem>>, %arg8: memref<1x128xi32, #tpu.memory_space<vmem>>, %arg9: memref<1x128xf32, #tpu.memory_space<vmem>>) attributes {dimension_semantics = [#tpu.dimension_semantics<arbitrary>], iteration_bounds = array<i64: 4>, scalar_prefetch = 2 : i64, scratch_operands = 1 : i64, tpu.core_type = #tpu.core_type<tc>, window_params = [{transform_indices = @transform_0, window_bounds = array<i64: 1, 32, 1>}, {pipeline_mode = #tpu.pipeline_mode<synchronous>, transform_indices = @transform_1, window_bounds = array<i64: 32, 128>}, {pipeline_mode = #tpu.pipeline_mode<synchronous>, transform_indices = @transform_2, window_bounds = array<i64: 1, 128>}, {transform_indices = @transform_3, window_bounds = array<i64: 1, 1, 128>}, {pipeline_mode = #tpu.pipeline_mode<synchronous>, transform_indices = @transform_4, window_bounds = array<i64: 32, 128>}, {pipeline_mode = #tpu.pipeline_mode<synchronous>, transform_indices = @transform_5, window_bounds = array<i64: 1, 128>}]} {
    %0 = tpu.iota {dimensions = array<i32: 1>} : vector<1x128xi32>
    %c0_i32 = arith.constant 0 : i32
    %1 = arith.cmpi eq, %arg0, %c0_i32 : i32
    %2 = arith.extui %1 : i1 to i32
    %c0_i32_0 = arith.constant 0 : i32
    %3 = arith.cmpi ne, %2, %c0_i32_0 : i32
    scf.if %3 {
      %c0_66 = arith.constant 0 : index
      %c0_67 = arith.constant 0 : index
      %194 = vector.load %arg4[%c0_66, %c0_67] : memref<32x128xf32, #tpu.memory_space<vmem>>, vector<32x128xf32>
      %c0_68 = arith.constant 0 : index
      %c0_69 = arith.constant 0 : index
      %195 = vector.load %arg7[%c0_68, %c0_69] : memref<32x128xf32, #tpu.memory_space<vmem>>, vector<32x128xf32>
      tpu.vector_store %arg7[%c0_68, %c0_69], %194 {strides = array<i32>} : memref<32x128xf32, #tpu.memory_space<vmem>>, vector<32x128xf32>,
      %c0_70 = arith.constant 0 : index
      %c0_71 = arith.constant 0 : index
      %196 = vector.load %arg5[%c0_70, %c0_71] : memref<1x128xi32, #tpu.memory_space<vmem>>, vector<1x128xi32>
      %c0_72 = arith.constant 0 : index
      %c0_73 = arith.constant 0 : index
      %197 = vector.load %arg8[%c0_72, %c0_73] : memref<1x128xi32, #tpu.memory_space<vmem>>, vector<1x128xi32>
      tpu.vector_store %arg8[%c0_72, %c0_73], %196 {strides = array<i32>} : memref<1x128xi32, #tpu.memory_space<vmem>>, vector<1x128xi32>,
      %c0_74 = arith.constant 0 : index
      %198 = memref.load %arg2[%c0_74] : memref<1xi32, #tpu.memory_space<smem>>
      %199 = vector.broadcast %198 : i32 to vector<1x128xi32>
      %200 = arith.cmpi slt, %0, %199 : vector<1x128xi32>
      %201 = arith.extui %200 : vector<1x128xi1> to vector<1x128xi32>
      %202 = arith.sitofp %201 : vector<1x128xi32> to vector<1x128xf32>
      %c0_75 = arith.constant 0 : index
      %c0_76 = arith.constant 0 : index
      %203 = vector.load %arg9[%c0_75, %c0_76] : memref<1x128xf32, #tpu.memory_space<vmem>>, vector<1x128xf32>
      tpu.vector_store %arg9[%c0_75, %c0_76], %202 {strides = array<i32>} : memref<1x128xf32, #tpu.memory_space<vmem>>, vector<1x128xf32>,
    } else {
    }
    %4 = arith.index_cast %arg0 : i32 to index
    %5 = memref.load %arg1[%4] : memref<4xi32, #tpu.memory_space<smem>>
    %c0 = arith.constant 0 : index
    %c0_1 = arith.constant 0 : index
    %c0_2 = arith.constant 0 : index
    %6 = vector.load %arg3[%c0, %c0_1, %c0_2] : memref<1x32x1xf32, #tpu.memory_space<vmem>>, vector<1x32x1xf32>
    %7 = vector.shape_cast %6 : vector<1x32x1xf32> to vector<32x1xf32>
    %cst = arith.constant 9.99999997E-7 : f32
    %8 = vector.broadcast %cst : f32 to vector<32x1xf32>
    %9 = arith.addf %7, %8 : vector<32x1xf32>
    %c0_3 = arith.constant 0 : index
    %c0_4 = arith.constant 0 : index
    %10 = vector.load %arg7[%c0_3, %c0_4] : memref<32x128xf32, #tpu.memory_space<vmem>>, vector<32x128xf32>
    %c0_5 = arith.constant 0 : index
    %c0_6 = arith.constant 0 : index
    %11 = vector.load %arg8[%c0_5, %c0_6] : memref<1x128xi32, #tpu.memory_space<vmem>>, vector<1x128xi32>
    %c0_7 = arith.constant 0 : index
    %c0_8 = arith.constant 0 : index
    %12 = vector.load %arg9[%c0_7, %c0_8] : memref<1x128xf32, #tpu.memory_space<vmem>>, vector<1x128xf32>
    %cst_9 = arith.constant 0.000000e+00 : f32
    %13 = vector.broadcast %cst_9 : f32 to vector<1x128xf32>
    %14 = arith.cmpf ogt, %12, %13 : vector<1x128xf32>
    %15 = vector.broadcast %9 : vector<32x1xf32> to vector<32x128xf32>
    %16 = arith.subf %15, %10 : vector<32x128xf32>
    %17 = arith.mulf %16, %16 : vector<32x128xf32>
    %cst_10 = arith.constant dense<0.000000e+00> : vector<128xf32>
    %18 = vector.multi_reduction <add>, %17, %cst_10 [0] : vector<32x128xf32> to vector<128xf32>
    %19 = vector.shape_cast %18 : vector<128xf32> to vector<1x128xf32>
    %20 = math.sqrt %19 : vector<1x128xf32>
    %21 = vector.broadcast %5 : i32 to vector<1x128xi32>
    %22 = arith.cmpi eq, %11, %21 : vector<1x128xi32>
    %23 = arith.andi %14, %22 : vector<1x128xi1>
    %24 = arith.extui %23 : vector<1x128xi1> to vector<1x128xi32>
    %25 = arith.sitofp %24 : vector<1x128xi32> to vector<1x128xf32>
    %cst_11 = arith.constant -1.000000e-01 : f32
    %26 = vector.broadcast %cst_11 : f32 to vector<1x128xf32>
    %27 = arith.mulf %26, %20 : vector<1x128xf32>
    %28 = math.exp %27 : vector<1x128xf32>
    %cst_12 = arith.constant 0.000000e+00 : f32
    %29 = vector.broadcast %cst_12 : f32 to vector<1x128xf32>
    %30 = arith.select %14, %28, %29 : vector<1x128xi1>, vector<1x128xf32>
    %cst_13 = arith.constant 1.000000e+30 : f32
    %31 = vector.broadcast %cst_13 : f32 to vector<1x128xf32>
    %32 = arith.select %23, %20, %31 : vector<1x128xi1>, vector<1x128xf32>
    %cst_14 = arith.constant dense<true> : vector<1x128xi1>
    %33 = arith.xori %23, %cst_14 : vector<1x128xi1>
    %34 = arith.andi %14, %33 : vector<1x128xi1>
    %cst_15 = arith.constant 1.000000e+30 : f32
    %35 = vector.broadcast %cst_15 : f32 to vector<1x128xf32>
    %36 = arith.select %34, %20, %35 : vector<1x128xi1>, vector<1x128xf32>
    %cst_16 = arith.constant 1.000000e+30 : f32
    %37 = vector.broadcast %cst_16 : f32 to vector<1x128xf32>
    %38 = arith.select %14, %20, %37 : vector<1x128xi1>, vector<1x128xf32>
    %39 = vector.shape_cast %32 : vector<1x128xf32> to vector<1x1x128xf32>
    %cst_17 = arith.constant dense<0x7F800000> : vector<1xf32>
    %40 = vector.multi_reduction <minimumf>, %39, %cst_17 [1, 2] : vector<1x1x128xf32> to vector<1xf32>
    %41 = vector.shape_cast %40 : vector<1xf32> to vector<1x1x1xf32>
    %42 = vector.extract %41[0, 0, 0] : f32 from vector<1x1x1xf32>
    %43 = vector.broadcast %42 : f32 to vector<1x1xf32>
    %44 = vector.shape_cast %36 : vector<1x128xf32> to vector<1x1x128xf32>
    %cst_18 = arith.constant dense<0x7F800000> : vector<1xf32>
    %45 = vector.multi_reduction <minimumf>, %44, %cst_18 [1, 2] : vector<1x1x128xf32> to vector<1xf32>
    %46 = vector.shape_cast %45 : vector<1xf32> to vector<1x1x1xf32>
    %47 = vector.extract %46[0, 0, 0] : f32 from vector<1x1x1xf32>
    %48 = vector.broadcast %47 : f32 to vector<1x1xf32>
    %49 = vector.shape_cast %38 : vector<1x128xf32> to vector<1x1x128xf32>
    %cst_19 = arith.constant dense<0x7F800000> : vector<1xf32>
    %50 = vector.multi_reduction <minimumf>, %49, %cst_19 [1, 2] : vector<1x1x128xf32> to vector<1xf32>
    %51 = vector.shape_cast %50 : vector<1xf32> to vector<1x1x1xf32>
    %52 = vector.extract %51[0, 0, 0] : f32 from vector<1x1x1xf32>
    %53 = vector.broadcast %52 : f32 to vector<1x1xf32>
    %54 = vector.shape_cast %25 : vector<1x128xf32> to vector<1x1x128xf32>
    %cst_20 = arith.constant dense<0xFF800000> : vector<1xf32>
    %55 = vector.multi_reduction <maximumf>, %54, %cst_20 [1, 2] : vector<1x1x128xf32> to vector<1xf32>
    %56 = vector.shape_cast %55 : vector<1xf32> to vector<1x1x1xf32>
    %57 = vector.extract %56[0, 0, 0] : f32 from vector<1x1x1xf32>
    %58 = vector.broadcast %57 : f32 to vector<1x1xf32>
    %cst_21 = arith.constant 0.000000e+00 : f32
    %59 = vector.broadcast %cst_21 : f32 to vector<1x1xf32>
    %60 = arith.cmpf ogt, %58, %59 : vector<1x1xf32>
    %cst_22 = arith.constant dense<true> : vector<1x1xi1>
    %61 = arith.xori %60, %cst_22 : vector<1x1xi1>
    %cst_23 = arith.constant 1.000000e+02 : f32
    %62 = vector.broadcast %cst_23 : f32 to vector<1x1xf32>
    %63 = arith.cmpf oge, %43, %62 : vector<1x1xf32>
    %64 = arith.ori %61, %63 : vector<1x1xi1>
    %65 = arith.extui %64 : vector<1x1xi1> to vector<1x1xi32>
    %66 = arith.sitofp %65 : vector<1x1xi32> to vector<1x1xf32>
    %67 = vector.shape_cast %30 : vector<1x128xf32> to vector<1x1x128xf32>
    %cst_24 = arith.constant dense<0.000000e+00> : vector<1xf32>
    %68 = vector.multi_reduction <add>, %67, %cst_24 [1, 2] : vector<1x1x128xf32> to vector<1xf32>
    %69 = vector.shape_cast %68 : vector<1xf32> to vector<1x1x1xf32>
    %70 = vector.extract %69[0, 0, 0] : f32 from vector<1x1x1xf32>
    %71 = vector.broadcast %70 : f32 to vector<1x1xf32>
    %cst_25 = arith.constant 0.999999463 : f32
    %72 = vector.broadcast %cst_25 : f32 to vector<1x1xf32>
    %73 = arith.mulf %66, %72 : vector<1x1xf32>
    %74 = arith.addf %71, %73 : vector<1x1xf32>
    %75 = arith.mulf %30, %25 : vector<1x128xf32>
    %76 = vector.shape_cast %75 : vector<1x128xf32> to vector<1x1x128xf32>
    %cst_26 = arith.constant dense<0.000000e+00> : vector<1xf32>
    %77 = vector.multi_reduction <add>, %76, %cst_26 [1, 2] : vector<1x1x128xf32> to vector<1xf32>
    %78 = vector.shape_cast %77 : vector<1xf32> to vector<1x1x1xf32>
    %79 = vector.extract %78[0, 0, 0] : f32 from vector<1x1x1xf32>
    %80 = vector.broadcast %79 : f32 to vector<1x1xf32>
    %cst_27 = arith.constant 0.999999463 : f32
    %81 = vector.broadcast %cst_27 : f32 to vector<1x1xf32>
    %82 = arith.mulf %66, %81 : vector<1x1xf32>
    %83 = arith.addf %80, %82 : vector<1x1xf32>
    %cst_28 = arith.constant 0.000000e+00 : f32
    %84 = vector.broadcast %cst_28 : f32 to vector<1x1xf32>
    %85 = arith.cmpf ogt, %74, %84 : vector<1x1xf32>
    %86 = math.log %74 : vector<1x1xf32>
    %87 = math.log %83 : vector<1x1xf32>
    %88 = arith.subf %86, %87 : vector<1x1xf32>
    %cst_29 = arith.constant 9.99999997E-7 : f32
    %89 = vector.broadcast %cst_29 : f32 to vector<1x1xf32>
    %90 = arith.addf %83, %89 : vector<1x1xf32>
    %91 = math.log %90 : vector<1x1xf32>
    %cst_30 = arith.constant 0.000000e+00 : f32
    %92 = vector.broadcast %cst_30 : f32 to vector<1x1xf32>
    %93 = arith.subf %92, %91 : vector<1x1xf32>
    %94 = arith.select %85, %88, %93 : vector<1x1xi1>, vector<1x1xf32>
    %cst_31 = arith.constant 5.65685423E-6 : f32
    %95 = vector.broadcast %cst_31 : f32 to vector<1x1xf32>
    %96 = arith.select %64, %95, %43 : vector<1x1xi1>, vector<1x1xf32>
    %cst_32 = arith.constant 1.000000e+01 : f32
    %97 = vector.broadcast %cst_32 : f32 to vector<1x1xf32>
    %98 = arith.subf %97, %96 : vector<1x1xf32>
    %cst_33 = arith.constant 1.000000e+00 : f32
    %99 = vector.broadcast %cst_33 : f32 to vector<1x1xf32>
    %100 = arith.subf %99, %98 : vector<1x1xf32>
    %cst_34 = arith.constant 1.000000e-01 : f32
    %101 = vector.broadcast %cst_34 : f32 to vector<1x1xf32>
    %102 = arith.mulf %101, %100 : vector<1x1xf32>
    %cst_35 = arith.constant 0.000000e+00 : f32
    %103 = vector.broadcast %cst_35 : f32 to vector<1x1xf32>
    %104 = arith.maximumf %102, %103 : vector<1x1xf32>
    %105 = math.absf %102 : vector<1x1xf32>
    %cst_36 = arith.constant 0.000000e+00 : f32
    %106 = vector.broadcast %cst_36 : f32 to vector<1x1xf32>
    %107 = arith.subf %106, %105 : vector<1x1xf32>
    %108 = math.exp %107 : vector<1x1xf32>
    %109 = math.log1p %108 : vector<1x1xf32>
    %110 = arith.addf %104, %109 : vector<1x1xf32>
    %cst_37 = arith.constant 1.000000e-01 : f32
    %111 = vector.broadcast %cst_37 : f32 to vector<1x1xf32>
    %112 = arith.divf %110, %111 : vector<1x1xf32>
    %cst_38 = arith.constant 5.65685423E-6 : f32
    %113 = vector.broadcast %cst_38 : f32 to vector<1x1xf32>
    %114 = arith.minimumf %43, %113 : vector<1x1xf32>
    %115 = arith.select %64, %114, %43 : vector<1x1xi1>, vector<1x1xf32>
    %cst_39 = arith.constant 5.65685423E-6 : f32
    %116 = vector.broadcast %cst_39 : f32 to vector<1x1xf32>
    %117 = arith.minimumf %53, %116 : vector<1x1xf32>
    %118 = arith.select %64, %117, %53 : vector<1x1xi1>, vector<1x1xf32>
    %119 = arith.cmpf ole, %115, %48 : vector<1x1xf32>
    %cst_40 = arith.constant 1.000000e+00 : f32
    %cst_41 = arith.constant -1.000000e+00 : f32
    %120 = vector.broadcast %cst_40 : f32 to vector<1x1xf32>
    %121 = vector.broadcast %cst_41 : f32 to vector<1x1xf32>
    %122 = arith.select %119, %120, %121 : vector<1x1xi1>, vector<1x1xf32>
    %cst_42 = arith.constant 1.000000e+01 : f32
    %123 = vector.broadcast %cst_42 : f32 to vector<1x1xf32>
    %124 = arith.subf %123, %118 : vector<1x1xf32>
    %125 = arith.mulf %122, %124 : vector<1x1xf32>
    %cst_43 = arith.constant 1.000000e+00 : f32
    %126 = vector.broadcast %cst_43 : f32 to vector<1x1xf32>
    %127 = arith.subf %126, %125 : vector<1x1xf32>
    %cst_44 = arith.constant 1.000000e-01 : f32
    %128 = vector.broadcast %cst_44 : f32 to vector<1x1xf32>
    %129 = arith.mulf %128, %127 : vector<1x1xf32>
    %cst_45 = arith.constant 0.000000e+00 : f32
    %130 = vector.broadcast %cst_45 : f32 to vector<1x1xf32>
    %131 = arith.maximumf %129, %130 : vector<1x1xf32>
    %132 = math.absf %129 : vector<1x1xf32>
    %cst_46 = arith.constant 0.000000e+00 : f32
    %133 = vector.broadcast %cst_46 : f32 to vector<1x1xf32>
    %134 = arith.subf %133, %132 : vector<1x1xf32>
    %135 = math.exp %134 : vector<1x1xf32>
    %136 = math.log1p %135 : vector<1x1xf32>
    %137 = arith.addf %131, %136 : vector<1x1xf32>
    %cst_47 = arith.constant 1.000000e-01 : f32
    %138 = vector.broadcast %cst_47 : f32 to vector<1x1xf32>
    %139 = arith.divf %137, %138 : vector<1x1xf32>
    %140 = arith.addf %112, %139 : vector<1x1xf32>
    %cst_48 = arith.constant 1.000000e-01 : f32
    %141 = vector.broadcast %cst_48 : f32 to vector<1x1xf32>
    %142 = arith.mulf %141, %140 : vector<1x1xf32>
    %143 = arith.addf %94, %142 : vector<1x1xf32>
    %cst_49 = arith.constant 0.000000e+00 : f32
    %144 = vector.broadcast %cst_49 : f32 to vector<1x1xf32>
    %145 = arith.select %60, %43, %144 : vector<1x1xi1>, vector<1x1xf32>
    %146 = vector.shape_cast %12 : vector<1x128xf32> to vector<1x1x128xf32>
    %cst_50 = arith.constant dense<0.000000e+00> : vector<1xf32>
    %147 = vector.multi_reduction <add>, %146, %cst_50 [1, 2] : vector<1x1x128xf32> to vector<1xf32>
    %148 = vector.shape_cast %147 : vector<1xf32> to vector<1x1x1xf32>
    %149 = vector.extract %148[0, 0, 0] : f32 from vector<1x1x1xf32>
    %150 = vector.broadcast %149 : f32 to vector<1x1xf32>
    %151 = arith.sitofp %0 : vector<1x128xi32> to vector<1x128xf32>
    %152 = vector.broadcast %150 : vector<1x1xf32> to vector<1x128xf32>
    %153 = arith.cmpf oeq, %151, %152 : vector<1x128xf32>
    %154 = vector.broadcast %64 : vector<1x1xi1> to vector<1x128xi1>
    %155 = arith.andi %153, %154 : vector<1x128xi1>
    %156 = vector.shape_cast %155 : vector<1x128xi1> to vector<1x128xi1>
    %157 = vector.broadcast %156 : vector<1x128xi1> to vector<32x128xi1>
    %158 = vector.shape_cast %7 : vector<32x1xf32> to vector<32x1xf32>
    %159 = vector.broadcast %158 : vector<32x1xf32> to vector<32x128xf32>
    %160 = arith.select %157, %159, %10 : vector<32x128xi1>, vector<32x128xf32>
    %c0_51 = arith.constant 0 : index
    %c0_52 = arith.constant 0 : index
    %161 = vector.load %arg7[%c0_51, %c0_52] : memref<32x128xf32, #tpu.memory_space<vmem>>, vector<32x128xf32>
    tpu.vector_store %arg7[%c0_51, %c0_52], %160 {strides = array<i32>} : memref<32x128xf32, #tpu.memory_space<vmem>>, vector<32x128xf32>,
    %162 = vector.broadcast %5 : i32 to vector<1x128xi32>
    %163 = arith.select %155, %162, %11 : vector<1x128xi1>, vector<1x128xi32>
    %c0_53 = arith.constant 0 : index
    %c0_54 = arith.constant 0 : index
    %164 = vector.load %arg8[%c0_53, %c0_54] : memref<1x128xi32, #tpu.memory_space<vmem>>, vector<1x128xi32>
    tpu.vector_store %arg8[%c0_53, %c0_54], %163 {strides = array<i32>} : memref<1x128xi32, #tpu.memory_space<vmem>>, vector<1x128xi32>,
    %cst_55 = arith.constant 1.000000e+00 : f32
    %165 = vector.broadcast %cst_55 : f32 to vector<1x128xf32>
    %166 = arith.select %155, %165, %12 : vector<1x128xi1>, vector<1x128xf32>
    %c0_56 = arith.constant 0 : index
    %c0_57 = arith.constant 0 : index
    %167 = vector.load %arg9[%c0_56, %c0_57] : memref<1x128xf32, #tpu.memory_space<vmem>>, vector<1x128xf32>
    tpu.vector_store %arg9[%c0_56, %c0_57], %166 {strides = array<i32>} : memref<1x128xf32, #tpu.memory_space<vmem>>, vector<1x128xf32>,
    %cst_58 = arith.constant 1.280000e+02 : f32
    %168 = vector.broadcast %cst_58 : f32 to vector<1x1xf32>
    %169 = arith.cmpf olt, %150, %168 : vector<1x1xf32>
    %170 = arith.andi %64, %169 : vector<1x1xi1>
    %cst_59 = arith.constant 1.000000e+00 : f32
    %cst_60 = arith.constant 0.000000e+00 : f32
    %171 = vector.broadcast %cst_59 : f32 to vector<1x1xf32>
    %172 = vector.broadcast %cst_60 : f32 to vector<1x1xf32>
    %173 = arith.select %170, %171, %172 : vector<1x1xi1>, vector<1x1xf32>
    %174 = arith.addf %150, %173 : vector<1x1xf32>
    %c0_i32_61 = arith.constant 0 : i32
    %175 = vector.broadcast %c0_i32_61 : i32 to vector<1x128xi32>
    %176 = arith.cmpi eq, %0, %175 : vector<1x128xi32>
    %c1_i32 = arith.constant 1 : i32
    %177 = vector.broadcast %c1_i32 : i32 to vector<1x128xi32>
    %178 = arith.cmpi eq, %0, %177 : vector<1x128xi32>
    %c2_i32 = arith.constant 2 : i32
    %179 = vector.broadcast %c2_i32 : i32 to vector<1x128xi32>
    %180 = arith.cmpi eq, %0, %179 : vector<1x128xi32>
    %cst_62 = arith.constant 0.000000e+00 : f32
    %181 = vector.shape_cast %174 : vector<1x1xf32> to vector<1x1xf32>
    %182 = vector.broadcast %181 : vector<1x1xf32> to vector<1x128xf32>
    %183 = vector.broadcast %cst_62 : f32 to vector<1x128xf32>
    %184 = arith.select %180, %182, %183 : vector<1x128xi1>, vector<1x128xf32>
    %185 = vector.shape_cast %145 : vector<1x1xf32> to vector<1x1xf32>
    %186 = vector.broadcast %185 : vector<1x1xf32> to vector<1x128xf32>
    %187 = arith.select %178, %186, %184 : vector<1x128xi1>, vector<1x128xf32>
    %188 = vector.shape_cast %143 : vector<1x1xf32> to vector<1x1xf32>
    %189 = vector.broadcast %188 : vector<1x1xf32> to vector<1x128xf32>
    %190 = arith.select %176, %189, %187 : vector<1x128xi1>, vector<1x128xf32>
    %c0_63 = arith.constant 0 : index
    %c0_64 = arith.constant 0 : index
    %c0_65 = arith.constant 0 : index
    %191 = vector.load %arg6[%c0_63, %c0_64, %c0_65] : memref<1x1x128xf32, #tpu.memory_space<vmem>>, vector<1x1x128xf32>
    %192 = vector.shape_cast %191 : vector<1x1x128xf32> to vector<1x128xf32>
    %193 = vector.shape_cast %190 : vector<1x128xf32> to vector<1x1x128xf32>
    tpu.vector_store %arg6[%c0_63, %c0_64, %c0_65], %193 {strides = array<i32>} : memref<1x1x128xf32, #tpu.memory_space<vmem>>, vector<1x1x128xf32>,
    return
  }
  func.func @transform_0(%arg0: i32, %arg1: memref<4xi32, #tpu.memory_space<smem>>, %arg2: memref<1xi32, #tpu.memory_space<smem>>) -> (i32, i32, i32) {
    %c0_i32 = arith.constant 0 : i32
    %c0_i32_0 = arith.constant 0 : i32
    %c0_i32_1 = arith.constant 0 : i32
    return %arg0, %c0_i32, %c0_i32_0 : i32, i32, i32
  }
  func.func @transform_1(%arg0: i32, %arg1: memref<4xi32, #tpu.memory_space<smem>>, %arg2: memref<1xi32, #tpu.memory_space<smem>>) -> (i32, i32) {
    %c0_i32 = arith.constant 0 : i32
    %c0_i32_0 = arith.constant 0 : i32
    %c0_i32_1 = arith.constant 0 : i32
    return %c0_i32, %c0_i32_0 : i32, i32
  }
  func.func @transform_2(%arg0: i32, %arg1: memref<4xi32, #tpu.memory_space<smem>>, %arg2: memref<1xi32, #tpu.memory_space<smem>>) -> (i32, i32) {
    %c0_i32 = arith.constant 0 : i32
    %c0_i32_0 = arith.constant 0 : i32
    %c0_i32_1 = arith.constant 0 : i32
    return %c0_i32, %c0_i32_0 : i32, i32
  }
  func.func @transform_3(%arg0: i32, %arg1: memref<4xi32, #tpu.memory_space<smem>>, %arg2: memref<1xi32, #tpu.memory_space<smem>>) -> (i32, i32, i32) {
    %c0_i32 = arith.constant 0 : i32
    %c0_i32_0 = arith.constant 0 : i32
    %c0_i32_1 = arith.constant 0 : i32
    return %arg0, %c0_i32, %c0_i32_0 : i32, i32, i32
  }
  func.func @transform_4(%arg0: i32, %arg1: memref<4xi32, #tpu.memory_space<smem>>, %arg2: memref<1xi32, #tpu.memory_space<smem>>) -> (i32, i32) {
    %c0_i32 = arith.constant 0 : i32
    %c0_i32_0 = arith.constant 0 : i32
    %c0_i32_1 = arith.constant 0 : i32
    return %c0_i32, %c0_i32_0 : i32, i32
  }
  func.func @transform_5(%arg0: i32, %arg1: memref<4xi32, #tpu.memory_space<smem>>, %arg2: memref<1xi32, #tpu.memory_space<smem>>) -> (i32, i32) {
    %c0_i32 = arith.constant 0 : i32
    %c0_i32_0 = arith.constant 0 : i32
    %c0_i32_1 = arith.constant 0 : i32
    return %c0_i32, %c0_i32_0 : i32, i32
  }
}

</mosaic_0001>

<bundles_post_ra>
// kernel: pairwise_dce_forward.1
= control target key start
LH: loop header
LB: loop body
LE: loop exit
PB: predicated region body
PF: predicated region fallthrough
CT: control target
= control target key end

     0   :  { %s1095_s0 = inlined_call_operand.vmem [shape: s32[4], index: 0, kind: input, shape index: {}]   ;;  %s1096_s1 = inlined_call_operand.<no memory space> [shape: s32[1], index: 1, kind: input, shape index: {}]   ;;  %s1097_s2 = inlined_call_operand.vmem [shape: f32[4,32,1], index: 2, kind: input, shape index: {}]   ;;  %s1098_s3 = inlined_call_operand.vmem [shape: f32[32,128], index: 3, kind: input, shape index: {}]   ;;  %s1099_s4 = inlined_call_operand.vmem [shape: s32[1,128], index: 4, kind: input, shape index: {}]   ;;  %s1100_s5 = inlined_call_operand.vmem [shape: f32[4,1,128], index: 5, kind: output, shape index: {0}]   ;;  %s1101_s6 = inlined_call_operand.hbm [shape: f32[32,128], index: 6, kind: output, shape index: {1}]   ;;  %s1102_s7 = inlined_call_operand.hbm [shape: s32[1,128], index: 7, kind: output, shape index: {2}]  }
   0x1   :  { %s13_s26 = sshll.u32 %s1095_s0, 4  ;;  %17 = sst [smem:[#allocation5]] %s1096_s1  ;;  %s14_s26 = int_to_ptr.vmem [resolvable:$true] %s13_s26 }
   0x2   :  { %s699_s29 = scalar_lea.vmem %s14_s26, 16  ;;  %p704_p1 = scmp.lt.s32.totalorder %s14_s26, %s14_s26 }
   0x3   :  { %p700_p0 = scmp.ne.s32.totalorder %s14_s26, %s699_s29  ;;  %p705_p2 = scmp.lt.s32.totalorder %s699_s29, %s699_s29 }
   0x5   :  { %p706_p3 = por %p705_p2, %p704_p1 }
   0x7   :  { %p707_p4 = pnand %p706_p3, %p700_p0 }
   0x9   :  { %710 = shalt.err (!%p707_p4)  }
   0xa   :  { %s781_s30 = smov [#allocation4]  }
   0xb   :  { %16 = dma.vmem_to_smem %s14_s26, 16, %s781_s30, [#allocation3] }
   0xc   :  { %767 = dma.done.wait [#allocation3], 16 }
   0xd   :  { %768 = vsyncadd [#allocation3], 4294967280 }
   0xe   :  { %19 = sfence }
   0xf   :  { %20 = vsyncpa [#allocation7], 0 }
  0x10   :  { %21 = vsyncpa [#allocation9], 0  ;;  %s837_s0 = smov 0  }
  0x11 LB: > { %s843_s1 = sadd.s32 4294967295, %s779_s0   ;;  %p621_p5 = scmp.ge.s32.totalorder %s779_s0, 1  ;;  %s779_s0 = sphi %s837_s0, %s27_s0  }
  0x12   : > { %p193_p6 = scmp.lt.s32.totalorder %s779_s0, 5 }
  0x14   : > { %p194_p7 = pnand %p621_p5, %p193_p6 }
  0x15   : > { %p219_p8 = scmp.lt.s32.totalorder (!%p194_p7), %s843_s1, 3  ;;  %v227_v0 = vlaneseq (!%p194_p7)  ;;  %p624_p9 = scmp.ne.s32.totalorder (!%p194_p7), %s843_s1, 0 }
  0x16   : > { %197 = sbr.rel (%p194_p7) target bundleno = 520 (0x208), region = 32 }
  0x17   : > { %v851_v1 = vand.u32 (!%p194_p7), 127, %v227_v0 }
  0x1d   : > { %s849_s8 = scalar_select %p219_p8, %s843_s1, 3 }
  0x1e   : > { %232 = sbr.rel (%p624_p9) target bundleno = 40 (0x28), region = 36  ;;  %v233_v2 = vld [vmem:[%s1098_s3] sm:$0xff] (!%p624_p9)  ;;  %v234_v3 = vld [vmem:[%s1098_s3 + $0x8] sm:$0xff] (!%p624_p9)  ;;  %v235_v4 = vld [vmem:[%s1098_s3 + $0x10] sm:$0xff] (!%p624_p9)  ;;  %s243_s22 = sld [smem:[#allocation5]] (!%p624_p9)  ;;  %v782_v8 = vmov (!%p624_p9), 0.0  }
  0x1f   : > { %s634_s9 = sshll.u32 %s849_s8, 5  ;;  %s226_s12 = scalar_lea.vmem %s1100_s5, %s849_s8  ;;  %237 = vst [vmem:[#allocation6] sm:$0xff] (!%p624_p9), %v233_v2  ;;  %238 = vst [vmem:[#allocation6 + $0x8] sm:$0xff] (!%p624_p9), %v234_v3  ;;  %v236_v5 = vld [vmem:[%s1098_s3 + $0x18] sm:$0xff] (!%p624_p9)  ;;  %v241_v6 = vld [vmem:[%s1099_s4] sm:$0x1] (!%p624_p9) }
  0x20   : > { %s223_s15 = scalar_lea.vmem %s1097_s2, %s634_s9  ;;  %239 = vst [vmem:[#allocation6 + $0x10] sm:$0xff] (!%p624_p9), %v235_v4  ;;  %240 = vst [vmem:[#allocation6 + $0x18] sm:$0xff] (!%p624_p9), %v236_v5 }
  0x21   : > { %242 = vst [vmem:[#allocation8] sm:$0x1] (!%p624_p9), %v241_v6 }
  0x24   : > { %v244_v7 = vstv (!%p624_p9), %s243_s22 }
  0x25   : > { %vm245_vm0 = vcmp.lt.s32.totalorder %v851_v1, %v244_v7 }
  0x26   : > { %v625_v9 = vsel %vm245_vm0, 1.0, %v782_v8 }
  0x27   : > { %248 = vst [vmem:[#allocation2] sm:$0x1] %v625_v9 }
  0x28 PF: > { %v878_v10 = vld [vmem:[%s223_s15 + $0x10] sm:$0xff]  ;;  %v880_v11 = vld [vmem:[%s223_s15] sm:$0xff]  ;;  %v882_v12 = vld [vmem:[%s223_s15 + $0x18] sm:$0xff]  ;;  %v783_v13 = vmov 0   ;;  %s903_s27 = sld [smem:[#allocation4 + %s843_s1]]  ;;  %vm784_vm4 = vmmov 1  }
  0x29   : > { %680 = vset.pattern.permute.xlu1 %v783_v13  ;;  %679 = vset.pattern.permute.xlu0 %v783_v13  ;;  %v256_v14 = vadd.f32 1e-06, %v878_v10  ;;  %v254_v15 = vadd.f32 1e-06, %v880_v11  ;;  %v886_v16 = vld [vmem:[%s223_s15 + $0x8] sm:$0xff]  ;;  %vm323_vm9 = vcmask 1040384  }
  0x2a   : > { %v257_v17 = vadd.f32 1e-06, %v882_v12  ;;  %v255_v18 = vadd.f32 1e-06, %v886_v16  ;;  %v890_v20 = vld [vmem:[#allocation6] sm:$0xff]  ;;  %v892_v22 = vld [vmem:[#allocation6 + $0x10] sm:$0xff] }
  0x2b   : > { %277 = vperm.xlu1 %680, %v256_v14   ;;  %267 = vperm.xlu0 %679, %v254_v15   ;;  %v894_v23 = vld [vmem:[#allocation6 + $0x8] sm:$0xff]  ;;  %v897_v25 = vld [vmem:[#allocation6 + $0x18] sm:$0xff]  ;;  %v905_v44 = vld [vmem:[#allocation8] sm:$0x1]  ;;  %v785_v60 = vmov 0.0   ;;  %s787_s14 = smov [#allocation6]  }
  0x2c   : > { %s534_s15 = sshll.u32 %s787_s14, 4  ;;  %s788_s16 = smov [#allocation8]   ;;  %s990_s15 = int_to_ptr.vmem [resolvable:$true] %s534_s15 }
  0x2d   : > { %s548_s17 = sshll.u32 %s788_s16, 4  ;;  %p657_p10 = scmp.eq.s32.totalorder %s843_s1, 3  ;;  %s1007_s17 = int_to_ptr.vmem [resolvable:$true] %s548_s17 }
  0x2e   : > { %v907_v45 = vld [vmem:[#allocation2] sm:$0x1]  ;;  %v309_v46 = vstv %s903_s27  ;;  %s711_s18 = scalar_lea.vmem %s990_s15, 512  ;;  %p718_p0 = scmp.lt.s32.totalorder %s990_s15, %s990_s15 }
  0x2f   : > { %282 = vperm.xlu1 %680, %v257_v17   ;;  %272 = vperm.xlu0 %679, %v255_v18   ;;  %vm264_vm1 = vcmp.gt.f32.partialorder %v907_v45, 0.0  ;;  %vm310_vm2 = vcmp.eq.s32.totalorder %v905_v44, %v309_v46  ;;  %v462_v6 = vsel %vm323_vm9, %v907_v45, 0.0  ;;  %p712_p11 = scmp.ne.s32.totalorder %s990_s15, %s711_s18  ;;  %p719_p1 = scmp.lt.s32.totalorder %s711_s18, %s711_s18 }
  0x30   : > { %vm916_vm3 = vmand %vm264_vm1, %vm310_vm2 }
  0x31   : > { %vm319_vm5 = vmxor %vm916_vm3, %vm784_vm4  ;;  %v626_v61 = vsel %vm916_vm3, 1.0, %v785_v60  ;;  %p713_p12 = pnand %p712_p11, %p657_p10  ;;  %p720_p2 = por %p719_p1, %p718_p0 }
  0x32   : > { %vm320_vm7 = vmand %vm264_vm1, %vm319_vm5  ;;  %v357_v63 = vsel %vm323_vm9, %v626_v61, -inf }
  0x33   : > { %p714_p13 = pneg %p713_p12 }
  0x35   : > { %p721_p3 = pnand %p720_p2, %p714_p13 }
  0xaa   : > { %v278_v19 = vpop.permute.xlu1 %277  ;;  %v268_v21 = vpop.permute.xlu0 %267 }
  0xab   : > { %v285_v24 = vsub.f32 %v268_v21, %v890_v20  ;;  %v287_v28 = vsub.f32 %v278_v19, %v892_v22 }
  0xad   : > { %v289_v30 = vmul.f32 %v285_v24, %v285_v24  ;;  %v291_v33 = vmul.f32 %v287_v28, %v287_v28 }
  0xae   : > { %v283_v26 = vpop.permute.xlu1 %282  ;;  %v273_v27 = vpop.permute.xlu0 %272 }
  0xaf   : > { %v286_v29 = vsub.f32 %v273_v27, %v894_v23  ;;  %v288_v31 = vsub.f32 %v283_v26, %v897_v25 }
  0xb1   : > { %v290_v32 = vmul.f32 %v286_v29, %v286_v29  ;;  %v292_v35 = vmul.f32 %v288_v31, %v288_v31 }
  0xb3   : > { %v293_v34 = vadd.f32 %v290_v32, %v289_v30 }
  0xb5   : > { %v294_v36 = vadd.f32 %v293_v34, %v291_v33 }
  0xb7   : > { %v295_v37 = vadd.f32 %v294_v36, %v292_v35 }
  0xb9   : > { %v296_v38 = vrot.slane %v295_v37, 4 }
  0xbb   : > { %v297_v39 = vadd.f32 %v296_v38, %v295_v37 }
  0xbd   : > { %v298_v40 = vrot.slane %v297_v39, 2 }
  0xbf   : > { %v299_v41 = vadd.f32 %v298_v40, %v297_v39 }
  0xc1   : > { %v300_v42 = vrot.slane %v299_v41, 1 }
  0xc3   : > { %v301_v43 = vadd.f32 %v300_v42, %v299_v41 }
  0xc5   : > { %681 = vrsqrt.f32 %v301_v43  ;;  %vm304_vm6 = vcmp.eq.f32.partialorder %v301_v43, inf  ;;  %v307_v50 = vand.u32 2147483648, %v301_v43  ;;  %vm306_vm8 = vcmp.eq.f32.partialorder %v301_v43, 0.0 }
  0xcf   : > { %v682_v48 = vpop.eup %681 }
  0xd0   : > { %v303_v49 = vmul.f32 %v682_v48, %v301_v43 }
  0xd2   : > { %v305_v51 = vsel %vm304_vm6, %v301_v43, %v303_v49 }
  0xd3   : > { %v308_v52 = vsel %vm306_vm8, %v307_v50, %v305_v51 }
  0xd4   : > { %v314_v53 = vmul.f32 -0.1, %v308_v52  ;;  %v321_v54 = vsel %vm320_vm7, %v308_v52, 1e+30  ;;  %v318_v55 = vsel %vm916_vm3, %v308_v52, 1e+30 }
  0xd5   : > { %v335_v56 = vsel %vm323_vm9, %v321_v54, inf  ;;  %v324_v57 = vsel %vm323_vm9, %v318_v55, inf  ;;  %v322_v59 = vsel %vm264_vm1, %v308_v52, 1e+30 }
  0xd6   : > { %v315_v58 = vmul.f32 1.442695, %v314_v53  ;;  %336 = vmin.xlane.f32.xlu1 %v335_v56  ;;  %325 = vmin.xlane.f32.xlu0 %v324_v57  ;;  %v346_v62 = vsel %vm323_vm9, %v322_v59, inf }
  0xd8   : > { %683 = vpow2.f32 %v315_v58 }
  0xda   : > { %347 = vmin.xlane.f32.xlu0 %v346_v62 }
  0xde   : > { %358 = vmax.xlane.f32.xlu0 %v357_v63 }
  0xe2   : > { %v684_v0 = vpop.eup %683 }
  0xe3   : > { %v317_v2 = vsel %vm264_vm1, %v684_v0, 0.0 }
  0xe4   : > { %v374_v3 = vsel %vm323_vm9, %v317_v2, 0.0  ;;  %v387_v4 = vmul.f32 %v626_v61, %v317_v2 }
  0xe5   : > { %375 = vadd.xlane.f32.xlu1 %v374_v3 }
  0xe6   : > { %v388_v5 = vsel %vm323_vm9, %v387_v4, 0.0 }
  0xe7   : > { %389 = vadd.xlane.f32.xlu0 %v388_v5 }
  0xe9   : > { %463 = vadd.xlane.f32.xlu1 %v462_v6 }
  0xfa   : > { %486 = vperm.xlu1 %680, %v886_v16  }
  0xfd   : > { %481 = vperm.xlu0 %679, %v880_v11  }
  0xfe   : > { %491 = vperm.xlu1 %680, %v878_v10  }
 0x101   : > { %496 = vperm.xlu0 %679, %v882_v12  }
 0x163   : > { %v337_v7 = vpop.xlane.xlu1 %336  ;;  %v326_v8 = vpop.xlane.xlu0 %325 }
 0x164   : > { %v338_v9 = vrot.slane %v337_v7, 4  ;;  %v327_v13 = vrot.slane %v326_v8, 4 }
 0x166   : > { %v339_v14 = vmin.f32 %v337_v7, %v338_v9  ;;  %v328_v15 = vmin.f32 %v326_v8, %v327_v13 }
 0x167   : > { %v348_v17 = vpop.xlane.xlu0 %347 }
 0x168   : > { %v340_v18 = vrot.slane %v339_v14, 2  ;;  %v329_v19 = vrot.slane %v328_v15, 2  ;;  %v349_v21 = vrot.slane %v348_v17, 4 }
 0x16a   : > { %v350_v24 = vmin.f32 %v348_v17, %v349_v21  ;;  %v330_v26 = vmin.f32 %v328_v15, %v329_v19  ;;  %v341_v27 = vmin.f32 %v339_v14, %v340_v18  ;;  %v786_v18 = vmov -1.0  }
 0x16b   : > { %v359_v16 = vpop.xlane.xlu0 %358 }
 0x16c   : > { %v351_v28 = vrot.slane %v350_v24, 2  ;;  %v360_v11 = vrot.slane %v359_v16, 4  ;;  %v331_v29 = vrot.slane %v330_v26, 1  ;;  %v342_v10 = vrot.slane %v341_v27, 1 }
 0x16e   : > { %v361_v30 = vmax.f32 %v359_v16, %v360_v11  ;;  %v332_v12 = vmin.f32 %v330_v26, %v331_v29  ;;  %v343_v31 = vmin.f32 %v341_v27, %v342_v10  ;;  %v352_v32 = vmin.f32 %v350_v24, %v351_v28 }
 0x16f   : > { %v473_v16 = vcvt.s32.f32 %v851_v1 }
 0x170   : > { %v362_v33 = vrot.slane %v361_v30, 2  ;;  %635 = vpush %v332_v12  ;;  %v353_v34 = vrot.slane %v352_v32, 1 }
 0x171   : > { %637 = vpush %v343_v31 }
 0x172   : > { %v376_v35 = vpop.xlane.xlu1 %375  ;;  %v354_v36 = vmin.f32 %v352_v32, %v353_v34  ;;  %v363_v37 = vmax.f32 %v361_v30, %v362_v33 }
 0x173   : > { %v377_v38 = vrot.slane %v376_v35, 4 }
 0x174   : > { %639 = vpush %v354_v36  ;;  %v390_v39 = vpop.xlane.xlu0 %389  ;;  %v364_v40 = vrot.slane %v363_v37, 1 }
 0x175   : > { %v378_v41 = vadd.f32 %v377_v38, %v376_v35  ;;  %v391_v42 = vrot.slane %v390_v39, 4 }
 0x176   : > { %v464_v43 = vpop.xlane.xlu1 %463  ;;  %v365_v47 = vmax.f32 %v363_v37, %v364_v40 }
 0x177   : > { %v379_v48 = vrot.slane %v378_v41, 2  ;;  %v392_v49 = vadd.f32 %v391_v42, %v390_v39  ;;  %v465_v50 = vrot.slane %v464_v43, 4 }
 0x178   : > { %641 = vpush %v365_v47 }
 0x179   : > { %v393_v51 = vrot.slane %v392_v49, 2  ;;  %v466_v52 = vadd.f32 %v465_v50, %v464_v43  ;;  %v380_v53 = vadd.f32 %v379_v48, %v378_v41 }
 0x17a   : > { %v487_v21 = vpop.permute.xlu1 %486 }
 0x17b   : > { %v467_v54 = vrot.slane %v466_v52, 2  ;;  %v381_v55 = vrot.slane %v380_v53, 1  ;;  %v394_v56 = vadd.f32 %v393_v51, %v392_v49 }
 0x17c   : > { %v482_v27 = vpop.permute.xlu0 %481 }
 0x17d   : > { %v382_v57 = vadd.f32 %v381_v55, %v380_v53  ;;  %v395_v58 = vrot.slane %v394_v56, 1  ;;  %v468_v59 = vadd.f32 %v467_v54, %v466_v52 }
 0x17e   : > { %v492_v12 = vpop.permute.xlu1 %491 }
 0x17f   : > { %643 = vpush %v382_v57  ;;  %v396_v61 = vadd.f32 %v395_v58, %v394_v56  ;;  %v469_v62 = vrot.slane %v468_v59, 1 }
 0x180   : > { %v497_v34 = vpop.permute.xlu0 %496 }
 0x181   : > { %645 = vpush %v396_v61  ;;  %v470_v63 = vadd.f32 %v469_v62, %v468_v59 }
 0x183   : > { %647 = vpush %v470_v63 }
 0x1a1   : > { %s636_s28 = spop %635 }
 0x1a2   : > { %s638_s29 = spop %637  ;;  %v946_v0 = vstv %s636_s28 }
 0x1a3   : > { %v432_v5 = vmin.f32 %v946_v0, 5.6568542e-06  ;;  %vm370_vm12 = vcmp.ge.f32.partialorder %v946_v0, 100.0  ;;  %v345_v8 = vstv %s638_s29 }
 0x1a5   : > { %s640_s30 = spop %639 }
 0x1a6   : > { %v356_v2 = vstv %s640_s30 }
 0x1a7   : > { %v434_v6 = vmin.f32 %v356_v2, 5.6568542e-06 }
 0x1a9   : > { %s642_s9 = spop %641 }
 0x1aa   : > { %v367_v3 = vstv %s642_s9 }
 0x1ab   : > { %vm948_vm10 = vcmp.gt.f32.partialorder %v367_v3, 0.0 }
 0x1ac   : > { %vm369_vm11 = vmxor %vm948_vm10, %vm784_vm4 }
 0x1ad   : > { %vm957_vm13 = vmor %vm369_vm11, %vm370_vm12 }
 0x1ae   : > { %v411_v9 = vsel %vm957_vm13, 5.6568542e-06, %v946_v0  ;;  %v433_v13 = vsel %vm957_vm13, %v432_v5, %v946_v0  ;;  %v435_v14 = vsel %vm957_vm13, %v434_v6, %v356_v2 }
 0x1af   : > { %v412_v15 = vsub.f32 10.0, %v411_v9  ;;  %vm436_vm14 = vcmp.le.f32.partialorder %v433_v13, %v345_v8  ;;  %v438_v17 = vsub.f32 10.0, %v435_v14 }
 0x1b0   : > { %v437_v19 = vsel %vm436_vm14, 1.0, %v786_v18  ;;  %s969_s10 = spop %643 }
 0x1b1   : > { %v413_v24 = vsub.f32 1.0, %v412_v15  ;;  %v439_v26 = vmul.f32 %v438_v17, %v437_v19 }
 0x1b2   : > { %s974_s11 = spop %645 }
 0x1b3   : > { %v972_v28 = vmul.f32 0.1, %v413_v24  ;;  %v440_v11 = vsub.f32 1.0, %v439_v26 }
 0x1b4   : > { %s648_s13 = spop %647 }
 0x1b5   : > { %v416_v29 = vand.u32 2147483647, %v972_v28  ;;  %v977_v10 = vmul.f32 0.1, %v440_v11  ;;  %v979_v30 = vstv %s648_s13 }
 0x1b6   : > { %vm474_vm15 = vcmp.eq.f32.partialorder %v473_v16, %v979_v30 }
 0x1b7   : > { %v417_v31 = vsub.f32 0.0, %v416_v29  ;;  %v443_v32 = vand.u32 2147483647, %v977_v10  ;;  %vm985_vm0 = vmand %vm474_vm15, %vm957_vm13 }
 0x1b8   : > { %v499_v35 = vsel %vm985_vm0, %v482_v27, %v890_v20  ;;  %v500_v36 = vsel %vm985_vm0, %v487_v21, %v894_v23  ;;  %v501_v37 = vsel %vm985_vm0, %v492_v12, %v892_v22  ;;  %v502_v40 = vsel %vm985_vm0, %v497_v34, %v897_v25 }
 0x1b9   : > { %v418_v38 = vmul.f32 1.442695, %v417_v31  ;;  %v444_v39 = vsub.f32 0.0, %v443_v32  ;;  %503 = vst [vmem:[#allocation6] sm:$0xff] %v499_v35  ;;  %504 = vst [vmem:[#allocation6 + $0x8] sm:$0xff] %v500_v36  ;;  %v509_v20 = vsel %vm985_vm0, 1.0, %v907_v45  ;;  %v507_v22 = vsel %vm985_vm0, %v309_v46, %v905_v44 }
 0x1ba   : > { %505 = vst [vmem:[#allocation6 + $0x10] sm:$0xff] %v501_v37  ;;  %506 = vst [vmem:[#allocation6 + $0x18] sm:$0xff] %v502_v40 }
 0x1bb   : > { %510 = vst [vmem:[#allocation2] sm:$0x1] %v509_v20  ;;  %685 = vpow2.f32 %v418_v38  ;;  %v445_v23 = vmul.f32 1.442695, %v444_v39 }
 0x1bc   : > { %724 = shalt.err (!%p721_p3)
}
 0x1bd   : > { %s725_s21 = scalar_lea.hbm %s1101_s6, 512 }
 0x1be   : > { %p726_p4 = scmp.ne.s32.totalorder %s1101_s6, %s725_s21  ;;  %p731_p7 = scmp.lt.u32.totalorder %s725_s21, %s1101_s6 }
 0x1c0   : > { %p727_p5 = pnand %p726_p4, %p657_p10 }
 0x1c2   : > { %p728_p6 = pneg %p727_p5 }
 0x1c4   : > { %p733_p8 = pnand %p731_p7, %p728_p6 }
 0x1c6   : > { %736 = shalt.err (!%p733_p8)
}
 0x1c7   : > { %s789_s26 = smov 128   ;;  %s790_s27 = smov 8   ;;  %508 = vst [vmem:[#allocation8] sm:$0x1] %v507_v22  ;;  %v627_v25 = vsel %vm957_vm13, 1.0, %v785_v60 }
 0x1c8   : > { %650 = dma.vmem_to_hbm [thread:$0]  (%p657_p10), %s990_s15, 512, %s1101_s6, [#allocation7], %s789_s26, %s789_s26, %s790_s27  }
 0x1c9   : > { %s737_s30 = scalar_lea.vmem %s1007_s17, 16  ;;  %s743_s9 = scalar_lea.vmem %s1007_s17, 32 }
 0x1ca   : > { %p738_p9 = scmp.ne.s32.totalorder %s1007_s17, %s737_s30  ;;  %p744_p13 = scmp.lt.s32.totalorder %s1007_s17, %s1007_s17 }
 0x1cb   : > { %p745_p0 = scmp.lt.s32.totalorder %s743_s9, %s737_s30 }
 0x1cc   : > { %p739_p11 = pnand %p738_p9, %p657_p10 }
 0x1cd   : > { %p746_p1 = por %p745_p0, %p744_p13 }
 0x1ce   : > { %p740_p12 = pneg %p739_p11 }
 0x1d0   : > { %p747_p2 = pnand %p746_p1, %p740_p12 }
 0x1d2   : > { %750 = shalt.err (!%p747_p2)
}
 0x1d3   : > { %s751_s15 = scalar_lea.hbm %s1102_s7, 16 }
 0x1d4   : > { %p752_p3 = scmp.ne.s32.totalorder %s1102_s7, %s751_s15  ;;  %p757_p6 = scmp.lt.u32.totalorder %s751_s15, %s1102_s7 }
 0x1d6   : > { %p753_p4 = pnand %p752_p3, %p657_p10 }
 0x1d8   : > { %p754_p5 = pneg %p753_p4 }
 0x1da   : > { %p759_p7 = pnand %p757_p6, %p754_p5 }
 0x1dc   : > { %762 = shalt.err (!%p759_p7)
}
 0x1dd   : > { %652 = dma.vmem_to_hbm [thread:$0]  (%p657_p10), %s1007_s17, 16, %s1102_s7, [#allocation9]   ;;  %687 = vpow2.f32 %v445_v23  ;;  %v398_v44 = vstv %s974_s11  ;;  %v385_v45 = vmul.f32 0.99999946, %v627_v25  ;;  %v686_v41 = vpop.eup %685  ;;  %v384_v48 = vstv %s969_s10 }
 0x1de   : > { %v420_v43 = vadd.f32 1.0, %v686_v41  ;;  %v423_v51 = vmul.f32 -0.5, %v686_v41  ;;  %v426_v54 = vand.u32 2147483647, %v686_v41  ;;  %vm511_vm1 = vcmp.lt.f32.partialorder %v979_v30, 128.0 }
 0x1df   : > { %v399_v46 = vadd.f32 %v398_v44, %v385_v45  ;;  %v386_v50 = vadd.f32 %v385_v45, %v384_v48  ;;  %v415_v63 = vmax.f32 %v972_v28, 0.0  ;;  %vm512_vm3 = vmand %vm957_vm13, %vm511_vm1  ;;  %v442_v9 = vmax.f32 %v977_v10, 0.0 }
 0x1e0   : > { %689 = vlog2.f32 %v420_v43  ;;  %v424_v53 = vadd.f32 1.0, %v423_v51  ;;  %vm427_vm2 = vcmp.lt.f32.partialorder %v426_v54, 0.0004427343  ;;  %v513_v15 = vsel %vm512_vm3, 1.0, %v785_v60 }
 0x1e1   : > { %v406_v42 = vadd.f32 1e-06, %v399_v46  ;;  %v514_v7 = vadd.f32 %v513_v15, %v979_v30  ;;  %vm517_vm5 = vcmp.eq.s32.totalorder %v851_v1, 2  ;;  %vm400_vm6 = vcmp.gt.f32.partialorder %v386_v50, 0.0 }
 0x1e2   : > { %v425_v61 = vmul.f32 %v686_v41, %v424_v53  ;;  %vm516_vm7 = vcmp.eq.s32.totalorder %v851_v1, 1  ;;  %vm515_vm8 = vcmp.eq.s32.totalorder %v851_v1, 0  ;;  %v461_v10 = vsel %vm948_vm10, %v946_v0, 0.0 }
 0x1e3   : > { %691 = vlog2.f32 %v406_v42  ;;  %v518_v60 = vsel %vm517_vm5, %v514_v7, 0.0 }
 0x1e4   : > { %v519_v12 = vsel %vm516_vm7, %v461_v10, %v518_v60 }
 0x1e7   : > { %v688_v47 = vpop.eup %687 }
 0x1e8   : > { %v447_v49 = vadd.f32 1.0, %v688_v47  ;;  %v450_v52 = vmul.f32 -0.5, %v688_v47  ;;  %v453_v57 = vand.u32 2147483647, %v688_v47 }
 0x1ea   : > { %693 = vlog2.f32 %v447_v49  ;;  %v451_v55 = vadd.f32 1.0, %v450_v52  ;;  %v690_v56 = vpop.eup %689  ;;  %vm454_vm4 = vcmp.lt.f32.partialorder %v453_v57, 0.0004427343 }
 0x1eb   : > { %695 = vlog2.f32 %v399_v46  ;;  %v422_v59 = vmul.f32 0.6931472, %v690_v56 }
 0x1ec   : > { %697 = vlog2.f32 %v386_v50  ;;  %v452_v5 = vmul.f32 %v688_v47, %v451_v55 }
 0x1ed   : > { %v692_v58 = vpop.eup %691  ;;  %v428_v2 = vsel %vm427_vm2, %v425_v61, %v422_v59 }
 0x1ee   : > { %v429_v8 = vadd.f32 %v428_v2, %v415_v63  ;;  %v408_v13 = vmul.f32 0.6931472, %v692_v58 }
 0x1f0   : > { %v431_v21 = vmul.f32 10.0, %v429_v8  ;;  %v409_v27 = vsub.f32 0.0, %v408_v13 }
 0x1f4   : > { %v694_v62 = vpop.eup %693 }
 0x1f5   : > { %v449_v3 = vmul.f32 0.6931472, %v694_v62  ;;  %v696_v6 = vpop.eup %695 }
 0x1f6   : > { %v698_v17 = vpop.eup %697  ;;  %v404_v19 = vmul.f32 0.6931472, %v696_v6 }
 0x1f7   : > { %v455_v14 = vsel %vm454_vm4, %v452_v5, %v449_v3  ;;  %v402_v26 = vmul.f32 0.6931472, %v698_v17 }
 0x1f8   : > { %v456_v18 = vadd.f32 %v455_v14, %v442_v9 }
 0x1f9   : > { %v405_v28 = vsub.f32 %v402_v26, %v404_v19 }
 0x1fa   : > { %v457_v24 = vmul.f32 10.0, %v456_v18 }
 0x1fb   : > { %v410_v29 = vsel %vm400_vm6, %v405_v28, %v409_v27 }
 0x1fc   : > { %v458_v16 = vadd.f32 %v457_v24, %v431_v21 }
 0x1fe   : > { %v459_v11 = vmul.f32 0.1, %v458_v16 }
 0x200   : > { %v460_v30 = vadd.f32 %v459_v11, %v410_v29 }
 0x202   : > { %v520_v31 = vsel %vm515_vm8, %v460_v30, %v519_v12 }
 0x203   : > { %521 = vst [vmem:[%s226_s12] sm:$0x1] %v520_v31 }
 0x204   : > { %770 = dma.done.wait (%p657_p10), [#allocation7], 512  }
 0x205   : > { %772 = vsyncadd (%p657_p10), [#allocation7], 4294966784 }
 0x206   : > { %774 = dma.done.wait (%p657_p10), [#allocation9], 16  }
 0x207   : > { %776 = vsyncadd (%p657_p10), [#allocation9], 4294967280 }
 0x208 PF: > { %s27_s0 = sadd.s32 1, %s779_s0  }
 0x209   : > { %p24_p8 = scmp.ge.s32.totalorder %s27_s0, 6  }
 0x20b   :  { %26 = sbr.rel (!%p24_p8) target bundleno = 17 (0x11), region = 83 }
 0x212   :  { %571 = vsyncpa [#allocation7], 1 }
 0x213   :  { %573 = vsyncpa [#allocation7 + $0x1], 1 }
 0x214   :  { %574 = vsyncpa [#allocation9], 1 }

</bundles_post_ra>
